<compile_context>
chip_gen: v5e
topology: v5e:2x2
jax: 0.10.0
libtpu: 0.0.40
codegen_flags: <defaults>
</compile_context>

<pallas_src>
import functools

import jax
import jax.numpy as jnp
from jax import lax
from jax.experimental import pallas as pl
from jax.experimental.pallas import tpu as pltpu

_LANE = 128        # TPU lane width (last dim alignment).
_SUBLANE_F32 = 8   # f32 sublane tile (second-to-last dim alignment).


def _round_up(n, m):
    return ((n + m - 1) // m) * m


def _apply_activation(y, activation: str):
    if activation == "sigmoid":
        return jax.nn.sigmoid(y)            # transcendental -> EUP slot
    if activation == "leakyrelu":
        # nn.LeakyReLU(negative_slope=0.01): max(y, 0.01*y) == where(y>=0, y, 0.01*y)
        return jnp.maximum(y, 0.01 * y)      # single VALU max, no cmp+select
    if activation == "linear":
        return y
    raise ValueError(f"Unsupported activation: {activation}")


def _mlp_fused_kernel(*refs, activation: str, num_layers: int, num_mid: int):
    """Fused MLP forward on one (tb, IN_pad) batch tile.

    refs layout (no scratch):
      num_layers == 1 : (x_ref, w_last_ref, o_ref)
      num_mid == 0    : (x_ref, w_first_ref, w_last_ref, o_ref)
      num_mid  > 0    : (x_ref, w_first_ref, w_mid_ref[L-2,H,H], w_last_ref, o_ref)

    All weights are pre-transposed to [IN_pad, OUT_pad]; intermediates stay in
    vregs/VMEM; only the final result is stored (lane-dense, unmasked vst).
    Matmul operands keep their input dtype; accumulation is f32.
    """
    x_ref = refs[0]
    o_ref = refs[-1]

    h = x_ref[...]

    if num_layers == 1:
        w_ref = refs[1]
        o_ref[...] = jnp.dot(
            h, w_ref[...], preferred_element_type=jnp.float32
        ).astype(o_ref.dtype)
        return

    # First layer (+ activation).
    w_first_ref = refs[1]
    h = _apply_activation(
        jnp.dot(h, w_first_ref[...], preferred_element_type=jnp.float32),
        activation,
    )

    idx = 2
    # Middle hidden->hidden layers: one stacked [num_mid, H_pad, H_pad] input.
    if num_mid > 0:
        w_mid_ref = refs[idx]
        idx += 1

        def body(i, carry):
            y = jnp.dot(carry, w_mid_ref[i], preferred_element_type=jnp.float32)
            return _apply_activation(y, activation)

        h = lax.fori_loop(0, num_mid, body, h, unroll=True)

    # Last layer: NO activation (matches MLP.forward); padded OUT lanes stay 0.
    w_last_ref = refs[idx]
    o_ref[...] = jnp.dot(
        h, w_last_ref[...], preferred_element_type=jnp.float32
    ).astype(o_ref.dtype)


@functools.partial(jax.jit, static_argnames=("mlp_type",))
def mlp_forward(x, weights, mlp_type: str):
    """Reproduces MLP.forward: activation on all layers except the last.

    x:       [batch, in_features]
    weights: list of [out_features_i, in_features_i] (PyTorch Linear layout)
    """
    batch, in_f = x.shape
    num_layers = len(weights)
    out_f = weights[-1].shape[0]
    assert weights[0].shape[1] == in_f, (weights[0].shape, in_f)

    in_pad = _round_up(in_f, _LANE)
    out_pad = _round_up(out_f, _LANE)

    # Batch tile / grid: "parallel" axis so v7x's second TensorCore gets work
    # once batch is non-trivial; grid=(1,) at tiny batches.
    tb = _LANE if batch >= _LANE else _round_up(batch, _SUBLANE_F32)
    batch_pad = _round_up(batch, tb)
    grid = (batch_pad // tb,)

    # Zero-pad x to (batch_pad, in_pad): padded rows/lanes are exact zeros.
    x_p = jnp.pad(x, ((0, batch_pad - batch), (0, in_pad - in_f)))

    # Pre-transpose once ([out,in] -> [in,out]) and pad BOTH dims to 128.
    # Zero-padded weight rows kill any non-zero values (e.g. sigmoid(0)=0.5)
    # sitting in padded activation lanes, so padding is exact.
    wts = []
    for w in weights:
        o_i, i_i = w.shape
        wt = jnp.transpose(w)
        wts.append(
            jnp.pad(
                wt,
                (
                    (0, _round_up(i_i, _LANE) - i_i),
                    (0, _round_up(o_i, _LANE) - o_i),
                ),
            )
        )

    # Stack equal-shaped middle hidden weights into one VMEM input.
    num_mid = max(num_layers - 2, 0)
    if num_layers == 1:
        kernel_weights = [wts[0]]
    elif num_mid == 0:
        kernel_weights = [wts[0], wts[-1]]
    else:
        kernel_weights = [wts[0], jnp.stack(wts[1:-1], axis=0), wts[-1]]

    # BlockSpecs: x/out tiled over batch; weights are full-array, grid-invariant.
    in_specs = [pl.BlockSpec((tb, in_pad), lambda i: (i, 0))]
    for w in kernel_weights:
        in_specs.append(
            pl.BlockSpec(tuple(w.shape), lambda i, nd=w.ndim: (0,) * nd)
        )
    out_specs = pl.BlockSpec((tb, out_pad), lambda i: (i, 0))

    # Advisory cost estimate (padded shapes) for the XLA scheduler.
    flops = 2 * batch_pad * sum(int(w.shape[0]) * int(w.shape[1]) for w in wts)
    transcendentals = (
        batch_pad * sum(int(w.shape[1]) for w in wts[:-1])
        if mlp_type == "sigmoid"
        else 0
    )
    bytes_accessed = (
        x_p.size * x_p.dtype.itemsize
        + sum(int(w.size) * w.dtype.itemsize for w in kernel_weights)
        + batch_pad * out_pad * x.dtype.itemsize
    )

    kernel = functools.partial(
        _mlp_fused_kernel,
        activation=mlp_type,
        num_layers=num_layers,
        num_mid=num_mid,
    )

    out_padded = pl.pallas_call(
        kernel,
        out_shape=jax.ShapeDtypeStruct((batch_pad, out_pad), x.dtype),
        grid=grid,
        in_specs=in_specs,
        out_specs=out_specs,
        compiler_params=pltpu.CompilerParams(
            dimension_semantics=("parallel",),
        ),
        cost_estimate=pl.CostEstimate(
            flops=flops,
            transcendentals=transcendentals,
            bytes_accessed=bytes_accessed,
        ),
    )(x_p, *kernel_weights)

    return out_padded[:batch, :out_f]


def mlp_forward_ref(x, weights, mlp_type: str):
    """Pure-JAX reference for validation."""

    def act(v):
        if mlp_type == "sigmoid":
            return jax.nn.sigmoid(v)
        if mlp_type == "leakyrelu":
            return jnp.where(v >= 0, v, 0.01 * v)
        return v

    for w in weights[:-1]:
        x = act(x @ w.T)
    return x @ weights[-1].T


if __name__ == "__main__":
    # Module config (small, consistent with the forward pass):
    #   input_size=16, hidden_size=32, output_size=4, num_hidden_layer=2
    batch = 8
    input_size = 16
    hidden_size = 32
    output_size = 4
    num_hidden_layer = 2

    key = jax.random.PRNGKey(0)
    k_x, k_w = jax.random.split(key)

    # Deterministic "custom_weights" in PyTorch Linear layout [out, in].
    layer_shapes = (
        [(hidden_size, input_size)]
        + [(hidden_size, hidden_size)] * (num_hidden_layer - 1)
        + [(output_size, hidden_size)]
    )
    w_keys = jax.random.split(k_w, len(layer_shapes))
    weights = [
        jax.random.normal(k, shp, dtype=jnp.float32) * 0.1
        for k, shp in zip(w_keys, layer_shapes)
    ]

    x = jax.random.normal(k_x, (batch, input_size), dtype=jnp.float32)

    for mlp_type in ("leakyrelu", "sigmoid", "linear"):
        out = jax.block_until_ready(mlp_forward(x, weights, mlp_type))
        ref = mlp_forward_ref(x, weights, mlp_type)
        assert out.shape == (batch, output_size), out.shape
        assert jnp.allclose(out, ref, atol=1e-5, rtol=1e-5), f"mismatch ({mlp_type})"

    print("KERNEL_OK")
</pallas_src>

<mosaic_0001>
module attributes {stable_mosaic.version = 11 : i64} {
  func.func @_mlp_fused_kernel(%arg0: i32, %arg1: memref<8x128xf32, #tpu.memory_space<vmem>>, %arg2: memref<128x128xf32, #tpu.memory_space<vmem>>, %arg3: memref<1x128x128xf32, #tpu.memory_space<vmem>>, %arg4: memref<128x128xf32, #tpu.memory_space<vmem>>, %arg5: memref<8x128xf32, #tpu.memory_space<vmem>>) attributes {dimension_semantics = [#tpu.dimension_semantics<parallel>], iteration_bounds = array<i64: 1>, scalar_prefetch = 0 : i64, scratch_operands = 0 : i64, tpu.core_type = #tpu.core_type<tc>, window_params = [{transform_indices = @transform_0, window_bounds = array<i64: 8, 128>}, {pipeline_mode = #tpu.pipeline_mode<synchronous>, transform_indices = @transform_1, window_bounds = array<i64: 128, 128>}, {pipeline_mode = #tpu.pipeline_mode<synchronous>, transform_indices = @transform_2, window_bounds = array<i64: 1, 128, 128>}, {pipeline_mode = #tpu.pipeline_mode<synchronous>, transform_indices = @transform_3, window_bounds = array<i64: 128, 128>}, {transform_indices = @transform_4, window_bounds = array<i64: 8, 128>}]} {
    %c0 = arith.constant 0 : index
    %c0_0 = arith.constant 0 : index
    %0 = vector.load %arg1[%c0, %c0_0] : memref<8x128xf32, #tpu.memory_space<vmem>>, vector<8x128xf32>
    %c0_1 = arith.constant 0 : index
    %c0_2 = arith.constant 0 : index
    %1 = vector.load %arg2[%c0_1, %c0_2] : memref<128x128xf32, #tpu.memory_space<vmem>>, vector<128x128xf32>
    %cst = arith.constant dense<0.000000e+00> : vector<8x128xf32>
    %2 = tpu.matmul %0, %1, %cst {dimension_numbers = #tpu.dot_dimension_numbers<[1], [0], [0], [1], [0, 0, 1, 1], [], []>} : vector<8x128xf32>, vector<128x128xf32>, vector<8x128xf32> -> vector<8x128xf32>
    %cst_3 = arith.constant 0.00999999977 : f32
    %3 = vector.broadcast %cst_3 : f32 to vector<8x128xf32>
    %4 = arith.mulf %3, %2 : vector<8x128xf32>
    %5 = arith.maximumf %2, %4 : vector<8x128xf32>
    %c0_i32 = arith.constant 0 : i32
    %6 = arith.index_cast %c0_i32 : i32 to index
    %c0_4 = arith.constant 0 : index
    %c0_5 = arith.constant 0 : index
    %7 = vector.load %arg3[%6, %c0_4, %c0_5] : memref<1x128x128xf32, #tpu.memory_space<vmem>>, vector<1x128x128xf32>
    %8 = vector.shape_cast %7 : vector<1x128x128xf32> to vector<128x128xf32>
    %cst_6 = arith.constant dense<0.000000e+00> : vector<8x128xf32>
    %9 = tpu.matmul %5, %8, %cst_6 {dimension_numbers = #tpu.dot_dimension_numbers<[1], [0], [0], [1], [0, 0, 1, 1], [], []>} : vector<8x128xf32>, vector<128x128xf32>, vector<8x128xf32> -> vector<8x128xf32>
    %cst_7 = arith.constant 0.00999999977 : f32
    %10 = vector.broadcast %cst_7 : f32 to vector<8x128xf32>
    %11 = arith.mulf %10, %9 : vector<8x128xf32>
    %12 = arith.maximumf %9, %11 : vector<8x128xf32>
    %c1_i32 = arith.constant 1 : i32
    %c0_8 = arith.constant 0 : index
    %c0_9 = arith.constant 0 : index
    %13 = vector.load %arg4[%c0_8, %c0_9] : memref<128x128xf32, #tpu.memory_space<vmem>>, vector<128x128xf32>
    %cst_10 = arith.constant dense<0.000000e+00> : vector<8x128xf32>
    %14 = tpu.matmul %12, %13, %cst_10 {dimension_numbers = #tpu.dot_dimension_numbers<[1], [0], [0], [1], [0, 0, 1, 1], [], []>} : vector<8x128xf32>, vector<128x128xf32>, vector<8x128xf32> -> vector<8x128xf32>
    %c0_11 = arith.constant 0 : index
    %c0_12 = arith.constant 0 : index
    %15 = vector.load %arg5[%c0_11, %c0_12] : memref<8x128xf32, #tpu.memory_space<vmem>>, vector<8x128xf32>
    tpu.vector_store %arg5[%c0_11, %c0_12], %14 {strides = array<i32>} : memref<8x128xf32, #tpu.memory_space<vmem>>, vector<8x128xf32>,
    return
  }
  func.func @transform_0(%arg0: i32) -> (i32, i32) {
    %c0_i32 = arith.constant 0 : i32
    %c0_i32_0 = arith.constant 0 : i32
    return %arg0, %c0_i32 : i32, i32
  }
  func.func @transform_1(%arg0: i32) -> (i32, i32) {
    %c0_i32 = arith.constant 0 : i32
    %c0_i32_0 = arith.constant 0 : i32
    %c0_i32_1 = arith.constant 0 : i32
    return %c0_i32, %c0_i32_0 : i32, i32
  }
  func.func @transform_2(%arg0: i32) -> (i32, i32, i32) {
    %c0_i32 = arith.constant 0 : i32
    %c0_i32_0 = arith.constant 0 : i32
    %c0_i32_1 = arith.constant 0 : i32
    %c0_i32_2 = arith.constant 0 : i32
    return %c0_i32, %c0_i32_0, %c0_i32_1 : i32, i32, i32
  }
  func.func @transform_3(%arg0: i32) -> (i32, i32) {
    %c0_i32 = arith.constant 0 : i32
    %c0_i32_0 = arith.constant 0 : i32
    %c0_i32_1 = arith.constant 0 : i32
    return %c0_i32, %c0_i32_0 : i32, i32
  }
  func.func @transform_4(%arg0: i32) -> (i32, i32) {
    %c0_i32 = arith.constant 0 : i32
    %c0_i32_0 = arith.constant 0 : i32
    return %arg0, %c0_i32 : i32, i32
  }
}

</mosaic_0001>

<bundles_post_ra>
// kernel: mlp_forward.1
= control target key start
LH: loop header
LB: loop body
LE: loop exit
PB: predicated region body
PF: predicated region fallthrough
CT: control target
= control target key end

     0   :  { %s310_s1 = inlined_call_operand.vmem [shape: f32[128,128], index: 1, kind: input, shape index: {}]   ;;  %s311_s2 = inlined_call_operand.vmem [shape: f32[1,128,128], index: 2, kind: input, shape index: {}]   ;;  %s312_s0 = inlined_call_operand.vmem [shape: f32[8,128], index: 0, kind: input, shape index: {}]   ;;  %s313_s3 = inlined_call_operand.vmem [shape: f32[128,128], index: 3, kind: input, shape index: {}]   ;;  %s314_s4 = inlined_call_operand.vmem [shape: f32[8,128], index: 4, kind: output, shape index: {}]  }
   0x1   :  { %v33_v0 = vld [vmem:[%s310_s1 + $0x78] sm:$0xff]  ;;  %v32_v1 = vld [vmem:[%s310_s1 + $0x70] sm:$0xff]  ;;  %v31_v2 = vld [vmem:[%s310_s1 + $0x68] sm:$0xff] }
   0x2   :  { %34 = vmatpush.msra.mxu0 %v33_v0  ;;  %v30_v3 = vld [vmem:[%s310_s1 + $0x60] sm:$0xff]  ;;  %v71_v4 = vld [vmem:[%s311_s2 + $0x78] sm:$0xff]  ;;  %v70_v6 = vld [vmem:[%s311_s2 + $0x70] sm:$0xff] }
   0x3   :  { %v29_v5 = vld [vmem:[%s310_s1 + $0x58] sm:$0xff]  ;;  %72 = vmatpush.msra.mxu1 %v71_v4  ;;  %v69_v7 = vld [vmem:[%s311_s2 + $0x68] sm:$0xff]  ;;  %v28_v8 = vld [vmem:[%s310_s1 + $0x50] sm:$0xff] }
   0x4   :  { %35 = vmatpush.msra.mxu0 %v32_v1  ;;  %v68_v9 = vld [vmem:[%s311_s2 + $0x60] sm:$0xff]  ;;  %v27_v10 = vld [vmem:[%s310_s1 + $0x48] sm:$0xff]  ;;  %v67_v11 = vld [vmem:[%s311_s2 + $0x58] sm:$0xff] }
   0x5   :  { %73 = vmatpush.msra.mxu1 %v70_v6  ;;  %v26_v12 = vld [vmem:[%s310_s1 + $0x40] sm:$0xff]  ;;  %v66_v13 = vld [vmem:[%s311_s2 + $0x50] sm:$0xff]  ;;  %v25_v14 = vld [vmem:[%s310_s1 + $0x38] sm:$0xff] }
   0x6   :  { %36 = vmatpush.msra.mxu0 %v31_v2  ;;  %v65_v15 = vld [vmem:[%s311_s2 + $0x48] sm:$0xff]  ;;  %v24_v16 = vld [vmem:[%s310_s1 + $0x30] sm:$0xff]  ;;  %v64_v17 = vld [vmem:[%s311_s2 + $0x40] sm:$0xff] }
   0x7   :  { %74 = vmatpush.msra.mxu1 %v69_v7  ;;  %v23_v18 = vld [vmem:[%s310_s1 + $0x28] sm:$0xff]  ;;  %v63_v19 = vld [vmem:[%s311_s2 + $0x38] sm:$0xff]  ;;  %v22_v20 = vld [vmem:[%s310_s1 + $0x20] sm:$0xff] }
   0x8   :  { %37 = vmatpush.msra.mxu0 %v30_v3  ;;  %v62_v21 = vld [vmem:[%s311_s2 + $0x30] sm:$0xff]  ;;  %v21_v22 = vld [vmem:[%s310_s1 + $0x18] sm:$0xff]  ;;  %v61_v23 = vld [vmem:[%s311_s2 + $0x28] sm:$0xff] }
   0x9   :  { %75 = vmatpush.msra.mxu1 %v68_v9  ;;  %v20_v24 = vld [vmem:[%s310_s1 + $0x10] sm:$0xff]  ;;  %v60_v25 = vld [vmem:[%s311_s2 + $0x20] sm:$0xff]  ;;  %v19_v26 = vld [vmem:[%s310_s1 + $0x8] sm:$0xff] }
   0xa   :  { %38 = vmatpush.msra.mxu0 %v29_v5  ;;  %v59_v27 = vld [vmem:[%s311_s2 + $0x18] sm:$0xff]  ;;  %v18_v28 = vld [vmem:[%s310_s1] sm:$0xff]  ;;  %v58_v30 = vld [vmem:[%s311_s2 + $0x10] sm:$0xff] }
   0xb   :  { %76 = vmatpush.msra.mxu1 %v67_v11  ;;  %v17_v29 = vld [vmem:[%s312_s0] sm:$0xff]  ;;  %v57_v31 = vld [vmem:[%s311_s2 + $0x8] sm:$0xff]  ;;  %v109_v33 = vld [vmem:[%s313_s3 + $0x78] sm:$0xff] }
   0xc   :  { %39 = vmatpush.msra.mxu0 %v28_v8  ;;  %v56_v32 = vld [vmem:[%s311_s2] sm:$0xff]  ;;  %v108_v34 = vld [vmem:[%s313_s3 + $0x70] sm:$0xff]  ;;  %110 = vmatpush.msra.mxu2 %v109_v33  ;;  %v107_v35 = vld [vmem:[%s313_s3 + $0x68] sm:$0xff] }
   0xd   :  { %77 = vmatpush.msra.mxu1 %v66_v13  ;;  %v106_v36 = vld [vmem:[%s313_s3 + $0x60] sm:$0xff]  ;;  %v105_v37 = vld [vmem:[%s313_s3 + $0x58] sm:$0xff]  ;;  %v104_v38 = vld [vmem:[%s313_s3 + $0x50] sm:$0xff] }
   0xe   :  { %40 = vmatpush.msra.mxu0 %v27_v10  ;;  %111 = vmatpush.msra.mxu2 %v108_v34  ;;  %v103_v39 = vld [vmem:[%s313_s3 + $0x48] sm:$0xff]  ;;  %v102_v40 = vld [vmem:[%s313_s3 + $0x40] sm:$0xff]  ;;  %v101_v41 = vld [vmem:[%s313_s3 + $0x38] sm:$0xff] }
   0xf   :  { %78 = vmatpush.msra.mxu1 %v65_v15  ;;  %v100_v42 = vld [vmem:[%s313_s3 + $0x30] sm:$0xff]  ;;  %v99_v43 = vld [vmem:[%s313_s3 + $0x28] sm:$0xff]  ;;  %v98_v44 = vld [vmem:[%s313_s3 + $0x20] sm:$0xff] }
  0x10   :  { %41 = vmatpush.msra.mxu0 %v26_v12  ;;  %112 = vmatpush.msra.mxu2 %v107_v35  ;;  %v97_v45 = vld [vmem:[%s313_s3 + $0x18] sm:$0xff]  ;;  %v96_v49 = vld [vmem:[%s313_s3 + $0x10] sm:$0xff]  ;;  %v95_v50 = vld [vmem:[%s313_s3 + $0x8] sm:$0xff] }
  0x11   :  { %79 = vmatpush.msra.mxu1 %v64_v17  ;;  %v94_v51 = vld [vmem:[%s313_s3] sm:$0xff] }
  0x12   :  { %42 = vmatpush.msra.mxu0 %v25_v14  ;;  %113 = vmatpush.msra.mxu2 %v106_v36 }
  0x13   :  { %80 = vmatpush.msra.mxu1 %v63_v19 }
  0x14   :  { %43 = vmatpush.msra.mxu0 %v24_v16  ;;  %114 = vmatpush.msra.mxu2 %v105_v37 }
  0x15   :  { %81 = vmatpush.msra.mxu1 %v62_v21 }
  0x16   :  { %44 = vmatpush.msra.mxu0 %v23_v18  ;;  %115 = vmatpush.msra.mxu2 %v104_v38 }
  0x17   :  { %82 = vmatpush.msra.mxu1 %v61_v23 }
  0x18   :  { %45 = vmatpush.msra.mxu0 %v22_v20  ;;  %116 = vmatpush.msra.mxu2 %v103_v39 }
  0x19   :  { %83 = vmatpush.msra.mxu1 %v60_v25 }
  0x1a   :  { %46 = vmatpush.msra.mxu0 %v21_v22  ;;  %117 = vmatpush.msra.mxu2 %v102_v40 }
  0x1b   :  { %84 = vmatpush.msra.mxu1 %v59_v27 }
  0x1c   :  { %47 = vmatpush.msra.mxu0 %v20_v24  ;;  %118 = vmatpush.msra.mxu2 %v101_v41 }
  0x1d   :  { %85 = vmatpush.msra.mxu1 %v58_v30 }
  0x1e   :  { %48 = vmatpush.msra.mxu0 %v19_v26  ;;  %119 = vmatpush.msra.mxu2 %v100_v42 }
  0x1f   :  { %86 = vmatpush.msra.mxu1 %v57_v31 }
  0x20   :  { %49 = vmatpush.msra.mxu0 %v18_v28  ;;  %120 = vmatpush.msra.mxu2 %v99_v43 }
  0x21   :  { %50 = vmatmul.f32.vlgmr.msra.gmra.mxu0 %v17_v29  ;;  %87 = vmatpush.msra.mxu1 %v56_v32 }
  0x22   :  { %121 = vmatpush.msra.mxu2 %v98_v44 }
  0x24   :  { %122 = vmatpush.msra.mxu2 %v97_v45 }
  0x26   :  { %123 = vmatpush.msra.mxu2 %v96_v49 }
  0x28   :  { %124 = vmatpush.msra.mxu2 %v95_v50 }
  0x2a   :  { %125 = vmatpush.msra.mxu2 %v94_v51 }
  0x9e   :  { %v51_v46 = vpop.f32.mrf.mxu0 }
  0x9f   :  { %v54_v47 = vmul.f32 0.01, %v51_v46 }
  0xa1   :  { %v55_v48 = vmax.f32 %v51_v46, %v54_v47 }
  0xa3   :  { %88 = vmatmul.f32.vlgmr.msra.gmra.mxu1 %v55_v48 }
 0x120   :  { %v89_v52 = vpop.f32.mrf.mxu1 }
 0x121   :  { %v92_v53 = vmul.f32 0.01, %v89_v52 }
 0x123   :  { %v93_v54 = vmax.f32 %v89_v52, %v92_v53 }
 0x125   :  { %126 = vmatmul.f32.vlgmr.msra.gmra.mxu2 %v93_v54 }
 0x1a8   :  { %v127_v55 = vpop.f32.mrf.mxu2 }
 0x1a9   :  { %130 = vst [vmem:[%s314_s4] sm:$0xff] %v127_v55 }

</bundles_post_ra>
